<compile_context>
chip_gen: v7x
topology: tpu7x:2x2x1
jax: 0.10.0
libtpu: 0.0.40
codegen_flags: <defaults>
</compile_context>

<pallas_src>
import jax
import jax.numpy as jnp
from jax.experimental import pallas as pl
from jax.experimental.pallas import tpu as pltpu

# ------------------------- model dimensions --------------------------------
DIM_OBS = 16      # dim_observation
DIM_ACT = 4       # dim_action
H1 = 10           # FC1 out
H2 = 50           # FC2 out
H3 = 10           # FC3 out
H4 = 1            # FC4 out

LANE = 128        # hidden feature dims are padded to one lane group
SUB = 8           # sublane multiple for the batch axis
MAX_TILE = 2048   # batch rows per grid step for large batches
MIN_SPLIT = 2 * SUB   # batches at least this big always get >= 2 grid steps

BIAS_LANE = H3    # h3 lane 10 is forced to 1.0 to carry FC4's bias


def _round_up(x, m):
    return ((x + m - 1) // m) * m


def _cdiv(a, b):
    return -(-a // b)


def _batch_tiling(batch):
    """Balanced (tile, padded_batch).

    * padding never exceeds one sublane group per grid step (no near-dead
      tiles like the old 1032 -> 1536 case),
    * batches >= MIN_SPLIT rows get an even number of >= 2 grid steps so the
      "parallel" axis can be split across both v7x TensorCores without a
      2+1 imbalance."""
    b8 = _round_up(max(batch, 1), SUB)
    num_steps = _cdiv(b8, MAX_TILE)
    if b8 >= MIN_SPLIT:
        num_steps = max(num_steps, 2)
    if num_steps > 1 and num_steps % 2:
        num_steps += 1
    tile = _round_up(_cdiv(b8, num_steps), SUB)
    return tile, tile * num_steps


# ------------------------------ kernel --------------------------------------
def critic_bcq_kernel(obs_ref, acts_ref, w1_ref, b1_ref, w2h_ref, w2a_ref,
                      b2_ref, w3_ref, b3_ref, w4_ref, out_ref):
    obs = obs_ref[...].astype(jnp.bfloat16)      # (TILE, 16)
    acts = acts_ref[...].astype(jnp.bfloat16)    # (TILE, 4)

    # FC1 + ReLU: (TILE,16)@(16,128), bf16 operands, f32 accumulate.
    # Live lanes [0,10); padded lanes are relu(0 + 0) == 0.
    h1 = jnp.dot(obs, w1_ref[...],
                 preferred_element_type=jnp.float32) + b1_ref[...]
    h1 = jnp.maximum(h1, 0.0)

    # FC2 on concat([h1, acts]) with NO concat:
    #   h1 half : (TILE,128)@(128,128)  (rows >= 10 of W2h are zero)
    #   acts half: (TILE,4)@(4,128)     (K=4, essentially free)
    h2 = (jnp.dot(h1.astype(jnp.bfloat16), w2h_ref[...],
                  preferred_element_type=jnp.float32)
          + jnp.dot(acts, w2a_ref[...],
                    preferred_element_type=jnp.float32)
          + b2_ref[...])
    h2 = jnp.maximum(h2, 0.0)

    # FC3 + ReLU.  b3's padded lane BIAS_LANE is 1.0 and W3 column BIAS_LANE
    # is zero, so h3[:, BIAS_LANE] == relu(1.0) == 1.0 -> carries FC4's bias.
    h3 = jnp.dot(h2.astype(jnp.bfloat16), w3_ref[...],
                 preferred_element_type=jnp.float32) + b3_ref[...]
    h3 = jnp.maximum(h3, 0.0)

    # FC4 on the VPU/XLU: broadcast-multiply by the w4 row (b4 folded in at
    # lane BIAS_LANE) and reduce across lanes.  No MXU matmul for one lane.
    out_ref[...] = jnp.sum(h3 * w4_ref[...], axis=-1, keepdims=True)


# ------------------------- one-time parameter prep ---------------------------
def pad_params(params):
    """Pad parameters ONCE, outside the hot path.  MXU weights stored in bf16
    (f32 accumulation happens in-kernel); biases and the FC4 row stay f32."""
    w1, b1, w2, b2, w3, b3, w4, b4 = params
    f32, bf16 = jnp.float32, jnp.bfloat16

    w1_p = jnp.zeros((DIM_OBS, LANE), f32).at[:, :H1].set(w1).astype(bf16)
    b1_p = jnp.zeros((1, LANE), f32).at[0, :H1].set(b1)

    # FC2 split: rows [0,10) of torch's W2 act on h1, rows [10,14) on acts.
    w2h_p = jnp.zeros((LANE, LANE), f32).at[:H1, :H2].set(w2[:H1]).astype(bf16)
    w2a_p = jnp.zeros((DIM_ACT, LANE), f32).at[:, :H2].set(w2[H1:]).astype(bf16)
    b2_p = jnp.zeros((1, LANE), f32).at[0, :H2].set(b2)

    w3_p = jnp.zeros((LANE, LANE), f32).at[:H2, :H3].set(w3).astype(bf16)
    # 1.0 in b3's padded lane BIAS_LANE -> h3 carries a constant 1 there.
    b3_p = (jnp.zeros((1, LANE), f32)
            .at[0, :H3].set(b3)
            .at[0, BIAS_LANE].set(1.0))

    # FC4 as a lane row (f32, used on the VPU): weights at lanes [0,10),
    # bias b4 at lane BIAS_LANE.
    w4_p = (jnp.zeros((1, LANE), f32)
            .at[0, :H3].set(w4[:, 0])
            .at[0, BIAS_LANE].set(b4[0]))

    return (w1_p, b1_p, w2h_p, w2a_p, b2_p, w3_p, b3_p, w4_p)


# ------------------------------ wrapper --------------------------------------
@jax.jit
def critic_bcq_forward(obs, acts, padded_params):
    """obs: (B, DIM_OBS) f32, acts: (B, DIM_ACT) f32 -> (B, 1) f32."""
    w1_p, b1_p, w2h_p, w2a_p, b2_p, w3_p, b3_p, w4_p = padded_params
    B = obs.shape[0]
    tile, B_pad = _batch_tiling(B)
    if B_pad != B:
        obs = jnp.pad(obs, ((0, B_pad - B), (0, 0)))
        acts = jnp.pad(acts, ((0, B_pad - B), (0, 0)))

    grid = (B_pad // tile,)

    obs_spec = pl.BlockSpec((tile, DIM_OBS), lambda i: (i, 0))
    acts_spec = pl.BlockSpec((tile, DIM_ACT), lambda i: (i, 0))
    # Weight/bias blocks have constant index_maps, so the pipeline never
    # re-fetches them after step 0; their buffers total well under 0.5 MB so
    # we keep the default pipeline_mode.
    w_full = pl.BlockSpec((LANE, LANE), lambda i: (0, 0))
    w1_spec = pl.BlockSpec((DIM_OBS, LANE), lambda i: (0, 0))
    w2a_spec = pl.BlockSpec((DIM_ACT, LANE), lambda i: (0, 0))
    row_spec = pl.BlockSpec((1, LANE), lambda i: (0, 0))
    # (tile, 1) output is a lane-masked store but only tile*4 bytes per step;
    # a lane-dense transposed output is not worth it at this size.
    out_spec = pl.BlockSpec((tile, 1), lambda i: (i, 0))

    out_p = pl.pallas_call(
        critic_bcq_kernel,
        out_shape=jax.ShapeDtypeStruct((B_pad, 1), jnp.float32),
        grid_spec=pltpu.PrefetchScalarGridSpec(
            num_scalar_prefetch=0,
            grid=grid,
            in_specs=[
                obs_spec, acts_spec,
                w1_spec, row_spec,            # FC1
                w_full, w2a_spec, row_spec,   # FC2 (h1 half, acts half, bias)
                w_full, row_spec,             # FC3 (bias carries the "1" lane)
                row_spec,                     # FC4 row (bias folded in)
            ],
            out_specs=out_spec,
        ),
        compiler_params=pltpu.CompilerParams(
            dimension_semantics=("parallel",)),
    )(obs, acts, w1_p, b1_p, w2h_p, w2a_p, b2_p, w3_p, b3_p, w4_p)

    return out_p[:B]


# ------------------------- deterministic params ------------------------------
def init_params(key):
    """PyTorch nn.Linear-style uniform(-1/sqrt(fan_in), 1/sqrt(fan_in)) init.

    Weights stored transposed vs torch: shape (in_features, out_features)."""
    def linear(key, fan_in, fan_out):
        kw, kb = jax.random.split(key)
        bound = 1.0 / jnp.sqrt(fan_in)
        w = jax.random.uniform(kw, (fan_in, fan_out), jnp.float32, -bound, bound)
        b = jax.random.uniform(kb, (fan_out,), jnp.float32, -bound, bound)
        return w, b

    k1, k2, k3, k4 = jax.random.split(key, 4)
    w1, b1 = linear(k1, DIM_OBS, H1)
    w2, b2 = linear(k2, H1 + DIM_ACT, H2)
    w3, b3 = linear(k3, H2, H3)
    w4, b4 = linear(k4, H3, H4)
    return (w1, b1, w2, b2, w3, b3, w4, b4)


# ------------------------------ references -----------------------------------
def reference_forward(obs, acts, params):
    """Full-f32 reference, identical to the torch module's forward."""
    w1, b1, w2, b2, w3, b3, w4, b4 = params
    h1 = jax.nn.relu(obs @ w1 + b1)
    combined = jnp.concatenate([h1, acts], axis=1)
    h2 = jax.nn.relu(combined @ w2 + b2)
    h3 = jax.nn.relu(h2 @ w3 + b3)
    return h3 @ w4 + b4


def _bf(x):
    return x.astype(jnp.bfloat16).astype(jnp.float32)


def reference_forward_bf16ops(obs, acts, params):
    """Reference using the kernel's exact bf16-operand / f32-accumulate cast
    points -- the tight structural-correctness check for the kernel."""
    w1, b1, w2, b2, w3, b3, w4, b4 = params
    h1 = jax.nn.relu(_bf(obs) @ _bf(w1) + b1)
    h2 = jax.nn.relu(_bf(h1) @ _bf(w2[:H1]) + _bf(acts) @ _bf(w2[H1:]) + b2)
    h3 = jax.nn.relu(_bf(h2) @ _bf(w3) + b3)
    return h3 @ w4 + b4


if __name__ == "__main__":
    key = jax.random.PRNGKey(0)
    kp, ko, ka, ko2, ka2 = jax.random.split(key, 5)

    params = init_params(kp)
    padded = pad_params(params)

    # Small deterministic example (batch=2) -> one 8-row tile.
    B = 2
    obs = jax.random.normal(ko, (B, DIM_OBS), jnp.float32)
    acts = jax.random.normal(ka, (B, DIM_ACT), jnp.float32)
    out = jax.block_until_ready(critic_bcq_forward(obs, acts, padded))
    assert out.shape == (B, H4), out.shape
    ref_q = reference_forward_bf16ops(obs, acts, params)
    ref_f = reference_forward(obs, acts, params)
    assert jnp.allclose(out, ref_q, atol=5e-3, rtol=5e-3), (out, ref_q)
    assert float(jnp.max(jnp.abs(out - ref_f))) < 0.25, (out, ref_f)

    # Larger, non-multiple batch: exercises padding, balanced tiling and the
    # multi-step "parallel" grid path (1030 -> 2 steps of 520 rows).
    B2 = 1030
    obs2 = jax.random.normal(ko2, (B2, DIM_OBS), jnp.float32)
    acts2 = jax.random.normal(ka2, (B2, DIM_ACT), jnp.float32)
    out2 = jax.block_until_ready(critic_bcq_forward(obs2, acts2, padded))
    assert out2.shape == (B2, H4), out2.shape
    ref2_q = reference_forward_bf16ops(obs2, acts2, params)
    ref2_f = reference_forward(obs2, acts2, params)
    assert jnp.allclose(out2, ref2_q, atol=5e-3, rtol=5e-3)
    assert float(jnp.max(jnp.abs(out2 - ref2_f))) < 0.25

    print("KERNEL_OK")
</pallas_src>

<mosaic_0001>
module attributes {stable_mosaic.version = 11 : i64} {
  func.func @critic_bcq_kernel(%arg0: i32, %arg1: memref<8x16xf32, #tpu.memory_space<vmem>>, %arg2: memref<8x4xf32, #tpu.memory_space<vmem>>, %arg3: memref<16x128xbf16, #tpu.memory_space<vmem>>, %arg4: memref<1x128xf32, #tpu.memory_space<vmem>>, %arg5: memref<128x128xbf16, #tpu.memory_space<vmem>>, %arg6: memref<4x128xbf16, #tpu.memory_space<vmem>>, %arg7: memref<1x128xf32, #tpu.memory_space<vmem>>, %arg8: memref<128x128xbf16, #tpu.memory_space<vmem>>, %arg9: memref<1x128xf32, #tpu.memory_space<vmem>>, %arg10: memref<1x128xf32, #tpu.memory_space<vmem>>, %arg11: memref<8x1xf32, #tpu.memory_space<vmem>>) attributes {dimension_semantics = [#tpu.dimension_semantics<parallel>], iteration_bounds = array<i64: 1>, scalar_prefetch = 0 : i64, scratch_operands = 0 : i64, tpu.core_type = #tpu.core_type<tc>, window_params = [{transform_indices = @transform_0, window_bounds = array<i64: 8, 16>}, {transform_indices = @transform_1, window_bounds = array<i64: 8, 4>}, {pipeline_mode = #tpu.pipeline_mode<synchronous>, transform_indices = @transform_2, window_bounds = array<i64: 16, 128>}, {pipeline_mode = #tpu.pipeline_mode<synchronous>, transform_indices = @transform_3, window_bounds = array<i64: 1, 128>}, {pipeline_mode = #tpu.pipeline_mode<synchronous>, transform_indices = @transform_4, window_bounds = array<i64: 128, 128>}, {pipeline_mode = #tpu.pipeline_mode<synchronous>, transform_indices = @transform_5, window_bounds = array<i64: 4, 128>}, {pipeline_mode = #tpu.pipeline_mode<synchronous>, transform_indices = @transform_6, window_bounds = array<i64: 1, 128>}, {pipeline_mode = #tpu.pipeline_mode<synchronous>, transform_indices = @transform_7, window_bounds = array<i64: 128, 128>}, {pipeline_mode = #tpu.pipeline_mode<synchronous>, transform_indices = @transform_8, window_bounds = array<i64: 1, 128>}, {pipeline_mode = #tpu.pipeline_mode<synchronous>, transform_indices = @transform_9, window_bounds = array<i64: 1, 128>}, {transform_indices = @transform_10, window_bounds = array<i64: 8, 1>}]} {
    %c0 = arith.constant 0 : index
    %c0_0 = arith.constant 0 : index
    %0 = vector.load %arg1[%c0, %c0_0] : memref<8x16xf32, #tpu.memory_space<vmem>>, vector<8x16xf32>
    %1 = arith.truncf %0 : vector<8x16xf32> to vector<8x16xbf16>
    %c0_1 = arith.constant 0 : index
    %c0_2 = arith.constant 0 : index
    %2 = vector.load %arg2[%c0_1, %c0_2] : memref<8x4xf32, #tpu.memory_space<vmem>>, vector<8x4xf32>
    %3 = arith.truncf %2 : vector<8x4xf32> to vector<8x4xbf16>
    %c0_3 = arith.constant 0 : index
    %c0_4 = arith.constant 0 : index
    %4 = vector.load %arg3[%c0_3, %c0_4] : memref<16x128xbf16, #tpu.memory_space<vmem>>, vector<16x128xbf16>
    %cst = arith.constant dense<0.000000e+00> : vector<8x128xf32>
    %5 = tpu.matmul %1, %4, %cst {dimension_numbers = #tpu.dot_dimension_numbers<[1], [0], [0], [1], [0, 0, 1, 1], [], []>} : vector<8x16xbf16>, vector<16x128xbf16>, vector<8x128xf32> -> vector<8x128xf32>
    %c0_5 = arith.constant 0 : index
    %c0_6 = arith.constant 0 : index
    %6 = vector.load %arg4[%c0_5, %c0_6] : memref<1x128xf32, #tpu.memory_space<vmem>>, vector<1x128xf32>
    %7 = vector.broadcast %6 : vector<1x128xf32> to vector<8x128xf32>
    %8 = arith.addf %5, %7 : vector<8x128xf32>
    %cst_7 = arith.constant 0.000000e+00 : f32
    %9 = vector.broadcast %cst_7 : f32 to vector<8x128xf32>
    %10 = arith.maximumf %8, %9 : vector<8x128xf32>
    %11 = arith.truncf %10 : vector<8x128xf32> to vector<8x128xbf16>
    %c0_8 = arith.constant 0 : index
    %c0_9 = arith.constant 0 : index
    %12 = vector.load %arg5[%c0_8, %c0_9] : memref<128x128xbf16, #tpu.memory_space<vmem>>, vector<128x128xbf16>
    %cst_10 = arith.constant dense<0.000000e+00> : vector<8x128xf32>
    %13 = tpu.matmul %11, %12, %cst_10 {dimension_numbers = #tpu.dot_dimension_numbers<[1], [0], [0], [1], [0, 0, 1, 1], [], []>} : vector<8x128xbf16>, vector<128x128xbf16>, vector<8x128xf32> -> vector<8x128xf32>
    %c0_11 = arith.constant 0 : index
    %c0_12 = arith.constant 0 : index
    %14 = vector.load %arg6[%c0_11, %c0_12] : memref<4x128xbf16, #tpu.memory_space<vmem>>, vector<4x128xbf16>
    %cst_13 = arith.constant dense<0.000000e+00> : vector<8x128xf32>
    %15 = tpu.matmul %3, %14, %cst_13 {dimension_numbers = #tpu.dot_dimension_numbers<[1], [0], [0], [1], [0, 0, 1, 1], [], []>} : vector<8x4xbf16>, vector<4x128xbf16>, vector<8x128xf32> -> vector<8x128xf32>
    %16 = arith.addf %13, %15 : vector<8x128xf32>
    %c0_14 = arith.constant 0 : index
    %c0_15 = arith.constant 0 : index
    %17 = vector.load %arg7[%c0_14, %c0_15] : memref<1x128xf32, #tpu.memory_space<vmem>>, vector<1x128xf32>
    %18 = vector.broadcast %17 : vector<1x128xf32> to vector<8x128xf32>
    %19 = arith.addf %16, %18 : vector<8x128xf32>
    %cst_16 = arith.constant 0.000000e+00 : f32
    %20 = vector.broadcast %cst_16 : f32 to vector<8x128xf32>
    %21 = arith.maximumf %19, %20 : vector<8x128xf32>
    %22 = arith.truncf %21 : vector<8x128xf32> to vector<8x128xbf16>
    %c0_17 = arith.constant 0 : index
    %c0_18 = arith.constant 0 : index
    %23 = vector.load %arg8[%c0_17, %c0_18] : memref<128x128xbf16, #tpu.memory_space<vmem>>, vector<128x128xbf16>
    %cst_19 = arith.constant dense<0.000000e+00> : vector<8x128xf32>
    %24 = tpu.matmul %22, %23, %cst_19 {dimension_numbers = #tpu.dot_dimension_numbers<[1], [0], [0], [1], [0, 0, 1, 1], [], []>} : vector<8x128xbf16>, vector<128x128xbf16>, vector<8x128xf32> -> vector<8x128xf32>
    %c0_20 = arith.constant 0 : index
    %c0_21 = arith.constant 0 : index
    %25 = vector.load %arg9[%c0_20, %c0_21] : memref<1x128xf32, #tpu.memory_space<vmem>>, vector<1x128xf32>
    %26 = vector.broadcast %25 : vector<1x128xf32> to vector<8x128xf32>
    %27 = arith.addf %24, %26 : vector<8x128xf32>
    %cst_22 = arith.constant 0.000000e+00 : f32
    %28 = vector.broadcast %cst_22 : f32 to vector<8x128xf32>
    %29 = arith.maximumf %27, %28 : vector<8x128xf32>
    %c0_23 = arith.constant 0 : index
    %c0_24 = arith.constant 0 : index
    %30 = vector.load %arg10[%c0_23, %c0_24] : memref<1x128xf32, #tpu.memory_space<vmem>>, vector<1x128xf32>
    %31 = vector.broadcast %30 : vector<1x128xf32> to vector<8x128xf32>
    %32 = arith.mulf %29, %31 : vector<8x128xf32>
    %cst_25 = arith.constant dense<0.000000e+00> : vector<8xf32>
    %33 = vector.multi_reduction <add>, %32, %cst_25 [1] : vector<8x128xf32> to vector<8xf32>
    %34 = vector.shape_cast %33 : vector<8xf32> to vector<8x1xf32>
    %c0_26 = arith.constant 0 : index
    %c0_27 = arith.constant 0 : index
    %35 = vector.load %arg11[%c0_26, %c0_27] : memref<8x1xf32, #tpu.memory_space<vmem>>, vector<8x1xf32>
    tpu.vector_store %arg11[%c0_26, %c0_27], %34 {strides = array<i32>} : memref<8x1xf32, #tpu.memory_space<vmem>>, vector<8x1xf32>,
    return
  }
  func.func @transform_0(%arg0: i32) -> (i32, i32) {
    %c0_i32 = arith.constant 0 : i32
    %c0_i32_0 = arith.constant 0 : i32
    return %arg0, %c0_i32 : i32, i32
  }
  func.func @transform_1(%arg0: i32) -> (i32, i32) {
    %c0_i32 = arith.constant 0 : i32
    %c0_i32_0 = arith.constant 0 : i32
    return %arg0, %c0_i32 : i32, i32
  }
  func.func @transform_2(%arg0: i32) -> (i32, i32) {
    %c0_i32 = arith.constant 0 : i32
    %c0_i32_0 = arith.constant 0 : i32
    %c0_i32_1 = arith.constant 0 : i32
    return %c0_i32, %c0_i32_0 : i32, i32
  }
  func.func @transform_3(%arg0: i32) -> (i32, i32) {
    %c0_i32 = arith.constant 0 : i32
    %c0_i32_0 = arith.constant 0 : i32
    %c0_i32_1 = arith.constant 0 : i32
    return %c0_i32, %c0_i32_0 : i32, i32
  }
  func.func @transform_4(%arg0: i32) -> (i32, i32) {
    %c0_i32 = arith.constant 0 : i32
    %c0_i32_0 = arith.constant 0 : i32
    %c0_i32_1 = arith.constant 0 : i32
    return %c0_i32, %c0_i32_0 : i32, i32
  }
  func.func @transform_5(%arg0: i32) -> (i32, i32) {
    %c0_i32 = arith.constant 0 : i32
    %c0_i32_0 = arith.constant 0 : i32
    %c0_i32_1 = arith.constant 0 : i32
    return %c0_i32, %c0_i32_0 : i32, i32
  }
  func.func @transform_6(%arg0: i32) -> (i32, i32) {
    %c0_i32 = arith.constant 0 : i32
    %c0_i32_0 = arith.constant 0 : i32
    %c0_i32_1 = arith.constant 0 : i32
    return %c0_i32, %c0_i32_0 : i32, i32
  }
  func.func @transform_7(%arg0: i32) -> (i32, i32) {
    %c0_i32 = arith.constant 0 : i32
    %c0_i32_0 = arith.constant 0 : i32
    %c0_i32_1 = arith.constant 0 : i32
    return %c0_i32, %c0_i32_0 : i32, i32
  }
  func.func @transform_8(%arg0: i32) -> (i32, i32) {
    %c0_i32 = arith.constant 0 : i32
    %c0_i32_0 = arith.constant 0 : i32
    %c0_i32_1 = arith.constant 0 : i32
    return %c0_i32, %c0_i32_0 : i32, i32
  }
  func.func @transform_9(%arg0: i32) -> (i32, i32) {
    %c0_i32 = arith.constant 0 : i32
    %c0_i32_0 = arith.constant 0 : i32
    %c0_i32_1 = arith.constant 0 : i32
    return %c0_i32, %c0_i32_0 : i32, i32
  }
  func.func @transform_10(%arg0: i32) -> (i32, i32) {
    %c0_i32 = arith.constant 0 : i32
    %c0_i32_0 = arith.constant 0 : i32
    return %arg0, %c0_i32 : i32, i32
  }
}

</mosaic_0001>

<bundles_post_ra>
// kernel: critic_bcq_forward.1
= control target key start
LH: loop header
LB: loop body
LE: loop exit
PB: predicated region body
PF: predicated region fallthrough
CT: control target
= control target key end

     0   :  { %15 = vsyncpa [#allocation3], 0  ;;  %s728_s0 = inlined_call_operand.vmem [shape: f32[8,16], index: 0, kind: input, shape index: {}]   ;;  %s729_s1 = inlined_call_operand.vmem [shape: f32[8,4], index: 1, kind: input, shape index: {}]   ;;  %s730_s2 = inlined_call_operand.vmem [shape: bf16[16,128], index: 2, kind: input, shape index: {}]   ;;  %s731_s3 = inlined_call_operand.vmem [shape: f32[1,128], index: 3, kind: input, shape index: {}]   ;;  %s732_s4 = inlined_call_operand.hbm [shape: bf16[128,128], index: 4, kind: input, shape index: {}]   ;;  %s733_s5 = inlined_call_operand.vmem [shape: bf16[4,128], index: 5, kind: input, shape index: {}]   ;;  %s734_s6 = inlined_call_operand.vmem [shape: f32[1,128], index: 6, kind: input, shape index: {}]   ;;  %s735_s7 = inlined_call_operand.hbm [shape: bf16[128,128], index: 7, kind: input, shape index: {}]   ;;  %s736_s8 = inlined_call_operand.vmem [shape: f32[1,128], index: 8, kind: input, shape index: {}]   ;;  %s737_s9 = inlined_call_operand.vmem [shape: f32[1,128], index: 9, kind: input, shape index: {}]   ;;  %s738_s10 = inlined_call_operand.vmem [shape: f32[8,1], index: 10, kind: output, shape index: {}]  }
   0x1   :  { %16 = vsyncpa [#allocation5], 0  ;;  %s590_s13 = smov [#allocation2]   ;;  %s542_s17 = scalar_lea.hbm %s732_s4, 1024 }
   0x2   :  { %s30_s14 = sshll.u32 %s590_s13, 4  ;;  %p543_p0 = scmp.ne.s32.totalorder %s732_s4, %s542_s17  ;;  %s31_s14 = int_to_ptr.vmem [resolvable:$true] %s30_s14 }
   0x3   :  { %p546_p1 = scmp.lt.u32.totalorder %s542_s17, %s732_s4 }
   0x5   :  { %p548_p2 = pnand %p546_p1, %p543_p0 }
   0x7   :  { %551 = shalt.err (!%p548_p2)
}
   0x8   :  { %s552_s22 = scalar_lea.vmem %s31_s14, 1024  ;;  %p557_p4 = scmp.lt.s32.totalorder %s31_s14, %s31_s14 }
   0x9   :  { %p553_p3 = scmp.ne.s32.totalorder %s31_s14, %s552_s22  ;;  %p558_p5 = scmp.lt.s32.totalorder %s552_s22, %s552_s22 }
   0xb   :  { %p559_p6 = por %p558_p5, %p557_p4 }
   0xd   :  { %p560_p7 = pnand %p559_p6, %p553_p3 }
   0xf   :  { %563 = shalt.err (!%p560_p7)
}
  0x10   :  { %s591_s23 = smov 64   ;;  %s592_s24 = smov 4  }
  0x11   :  { %36 = dma.hbm_to_vmem [thread:$0]  %s732_s4, 1024, %s31_s14, [#allocation3], %s591_s23, %s591_s23, %s592_s24  }
  0x12   :  { %s593_s27 = smov [#allocation4]   ;;  %s564_s11 = scalar_lea.hbm %s735_s7, 1024 }
  0x13   :  { %s46_s28 = sshll.u32 %s593_s27, 4  ;;  %p565_p8 = scmp.ne.s32.totalorder %s735_s7, %s564_s11  ;;  %s47_s28 = int_to_ptr.vmem [resolvable:$true] %s46_s28 }
  0x14   :  { %p568_p9 = scmp.lt.u32.totalorder %s564_s11, %s735_s7 }
  0x16   :  { %p570_p10 = pnand %p568_p9, %p565_p8 }
  0x18   :  { %573 = shalt.err (!%p570_p10)
}
  0x19   :  { %s574_s17 = scalar_lea.vmem %s47_s28, 1024  ;;  %p579_p12 = scmp.lt.s32.totalorder %s47_s28, %s47_s28 }
  0x1a   :  { %p575_p11 = scmp.ne.s32.totalorder %s47_s28, %s574_s17  ;;  %p580_p13 = scmp.lt.s32.totalorder %s574_s17, %s574_s17 }
  0x1c   :  { %p581_p0 = por %p580_p13, %p579_p12 }
  0x1e   :  { %p582_p1 = pnand %p581_p0, %p575_p11 }
  0x20   :  { %585 = shalt.err (!%p582_p1)
}
  0x21   :  { %52 = dma.hbm_to_vmem [thread:$0]  %s735_s7, 1024, %s47_s28, [#allocation5], %s591_s23, %s591_s23, %s592_s24  }
  0x22   :  { %586 = dma.done.wait [#allocation3], 1024  }
  0x23   :  { %587 = vsyncadd [#allocation3], 4294966272 }
  0x24   :  { %588 = dma.done.wait [#allocation5], 1024  }
  0x25   :  { %589 = vsyncadd [#allocation5], 4294966272  ;;  %v594_v0 = vmov 0.0   ;;  %vm595_vm0 = vmmov 0   ;;  %v525_v1 = vld [vmem:[%s730_s2] sm:$0xff]   ;;  %vm83_vm1 = vcmask 130048  }
  0x26   :  { %467 = vmatprep.subr.bf16.mxu0 %v594_v0  ;;  %469 = vmatprep.mubr.msk.bf16.mxu0 %vm595_vm0, %v594_v0  ;;  %v64_v2 = vld [vmem:[%s728_s0] sm:$0xff]  ;;  %v527_v5 = vld [vmem:[#allocation2 + $0x8] sm:$0xff]   ;;  %v528_v6 = vld [vmem:[#allocation2 + $0x10] sm:$0xff]   ;;  %vm150_vm2 = vcmask 1041408   ;;  %vm146_vm3 = vcmask 31744   ;;  %vm414_vm4 = vcmask 7168  }
  0x27   :  { %473 = vmatprep.subr.bf16.mxu1 %v594_v0  ;;  %475 = vmatprep.mubr.msk.bf16.mxu1 %vm595_vm0, %v594_v0  ;;  %v65_v3 = vpack.c.bf16 %v64_v2, %v64_v2  ;;  %v526_v4 = vld [vmem:[#allocation2] sm:$0xff]   ;;  %v529_v7 = vld [vmem:[#allocation2 + $0x18] sm:$0xff]   ;;  %v531_v9 = vld [vmem:[#allocation2 + $0x28] sm:$0xff]  }
  0x28   :  { %468 = vmatpush3.bf16.msra.mxu0 %v525_v1  ;;  %v530_v8 = vld [vmem:[#allocation2 + $0x20] sm:$0xff]   ;;  %v532_v10 = vld [vmem:[#allocation2 + $0x30] sm:$0xff]   ;;  %v533_v15 = vld [vmem:[#allocation2 + $0x38] sm:$0xff]  }
  0x29   :  { %479 = vmatprep.subr.bf16.mxu0 %v594_v0  ;;  %v145_v11 = vld [vmem:[%s733_s5] sm:$0x3]  ;;  %v535_v17 = vld [vmem:[#allocation4 + $0x8] sm:$0xff]   ;;  %v536_v18 = vld [vmem:[#allocation4 + $0x10] sm:$0xff]  }
  0x2a   :  { %v152_v12 = vsel %vm150_vm2, %v145_v11, 0  ;;  %v66_v13 = vld [vmem:[%s729_s1] sm:$0xff]  ;;  %v537_v19 = vld [vmem:[#allocation4 + $0x18] sm:$0xff]   ;;  %v539_v21 = vld [vmem:[#allocation4 + $0x28] sm:$0xff]  }
  0x2b   :  { %470 = vmatmul.mubr.msk.bf16.vlgmr.msra.gmra.mrb[0].mxu0 %vm83_vm1, %v65_v3  ;;  %474 = vmatpush3.bf16.msra.mxu1 %v152_v12  ;;  %v67_v14 = vpack.c.bf16 %v66_v13, %v66_v13  ;;  %v534_v16 = vld [vmem:[#allocation4] sm:$0xff]   ;;  %v540_v34 = vld [vmem:[#allocation4 + $0x30] sm:$0xff]   ;;  %v541_v35 = vld [vmem:[#allocation4 + $0x38] sm:$0xff]  }
  0x2c   :  { %480 = vmatpush3.bf16.msra.mxu0 %v526_v4  ;;  %495 = vmatprep.mubr.msk.bf16.mxu0 %vm595_vm0, %v594_v0  ;;  %v538_v20 = vld [vmem:[#allocation4 + $0x20] sm:$0xff]  }
  0x2d   :  { %481 = vmatprep.subr.bf16.mxu0 %v594_v0  ;;  %499 = vmatprep.subr.bf16.mxu1 %v594_v0  ;;  %v422_v22 = vld [vmem:[%s731_s3] ss:$0 sm:$0xff] }
  0x2e   :  { %476 = vmatmul.mubr.msk.bf16.vlgmr.msra.gmra.mrb[0].mxu1 %vm146_vm3, %v67_v14  ;;  %v434_v37 = vld [vmem:[%s734_s6] ss:$0 sm:$0xff] }
  0x2f   :  { %515 = vmatprep.mubr.msk.bf16.mxu1 %vm595_vm0, %v594_v0  ;;  %500 = vmatpush3.bf16.msra.mxu1 %v534_v16  ;;  %v435_v45 = vld [vmem:[%s736_s8] ss:$0 sm:$0xff] }
  0x30   :  { %482 = vmatpush3.bf16.msra.mxu0 %v527_v5  ;;  %501 = vmatprep.subr.bf16.mxu1 %v594_v0  ;;  %v444_v50 = vld [vmem:[%s737_s9] ss:$0 sm:$0xff] }
  0x31   :  { %483 = vmatprep.subr.bf16.mxu0 %v594_v0 }
  0x33   :  { %502 = vmatpush3.bf16.msra.mxu1 %v535_v17 }
  0x34   :  { %484 = vmatpush3.bf16.msra.mxu0 %v528_v6  ;;  %503 = vmatprep.subr.bf16.mxu1 %v594_v0 }
  0x35   :  { %485 = vmatprep.subr.bf16.mxu0 %v594_v0 }
  0x37   :  { %504 = vmatpush3.bf16.msra.mxu1 %v536_v18 }
  0x38   :  { %486 = vmatpush3.bf16.msra.mxu0 %v529_v7  ;;  %505 = vmatprep.subr.bf16.mxu1 %v594_v0 }
  0x39   :  { %487 = vmatprep.subr.bf16.mxu0 %v594_v0 }
  0x3b   :  { %506 = vmatpush3.bf16.msra.mxu1 %v537_v19 }
  0x3c   :  { %488 = vmatpush3.bf16.msra.mxu0 %v530_v8  ;;  %507 = vmatprep.subr.bf16.mxu1 %v594_v0 }
  0x3d   :  { %489 = vmatprep.subr.bf16.mxu0 %v594_v0 }
  0x3f   :  { %508 = vmatpush3.bf16.msra.mxu1 %v538_v20 }
  0x40   :  { %490 = vmatpush3.bf16.msra.mxu0 %v531_v9  ;;  %509 = vmatprep.subr.bf16.mxu1 %v594_v0 }
  0x41   :  { %491 = vmatprep.subr.bf16.mxu0 %v594_v0 }
  0x43   :  { %510 = vmatpush3.bf16.msra.mxu1 %v539_v21 }
  0x44   :  { %492 = vmatpush3.bf16.msra.mxu0 %v532_v10  ;;  %511 = vmatprep.subr.bf16.mxu1 %v594_v0 }
  0x45   :  { %493 = vmatprep.subr.bf16.mxu0 %v594_v0 }
  0x47   :  { %512 = vmatpush3.bf16.msra.mxu1 %v540_v34 }
  0x48   :  { %494 = vmatpush3.bf16.msra.mxu0 %v533_v15  ;;  %513 = vmatprep.subr.bf16.mxu1 %v594_v0 }
  0x4b   :  { %514 = vmatpush3.bf16.msra.mxu1 %v541_v35 }
  0xfe   :  { %v121_v23 = vpop.f32.mrb[0].mxu0 }
  0xff   :  { %v122_v24 = vadd.f32 %v422_v22, %v121_v23  ;;  %v471_v25 = vpop.f32.mrb[1].mxu0 }
 0x100   :  { %v124_v26 = vpop.f32.mrb[2].mxu0 }
 0x101   :  { %v127_v27 = vmax.f32 %v122_v24, 0.0  ;;  %v472_v28 = vpop.f32.mrb[3].mxu0  ;;  %v188_v30 = vpop.f32.mrb[0].mxu1 }
 0x102   :  { %v477_v31 = vpop.f32.mrb[1].mxu1 }
 0x103   :  { %v128_v29 = vpack.c.bf16 %v127_v27, %v127_v27  ;;  %v191_v32 = vpop.f32.mrb[2].mxu1 }
 0x104   :  { %v478_v33 = vpop.f32.mrb[3].mxu1 }
 0x105   :  { %496 = vmatmul.mubr.bf16.vlgmr.msra.gmra.mrb[4].mxu0 %v128_v29 }
 0x1d8   :  { %v276_v36 = vpop.f32.mrb[4].mxu0 }
 0x1d9   :  { %v277_v38 = vadd.f32 %v276_v36, %v188_v30  ;;  %v497_v39 = vpop.f32.mrb[5].mxu0 }
 0x1da   :  { %v279_v40 = vpop.f32.mrb[6].mxu0 }
 0x1db   :  { %v289_v41 = vadd.f32 %v434_v37, %v277_v38  ;;  %v498_v42 = vpop.f32.mrb[7].mxu0 }
 0x1dd   :  { %v290_v43 = vmax.f32 %v289_v41, 0.0 }
 0x1df   :  { %v291_v44 = vpack.c.bf16 %v290_v43, %v290_v43 }
 0x1e1   :  { %516 = vmatmul.mubr.bf16.vlgmr.msra.gmra.mrb[4].mxu1 %v291_v44 }
 0x2b4   :  { %v397_v46 = vpop.f32.mrb[4].mxu1 }
 0x2b5   :  { %v398_v47 = vadd.f32 %v435_v45, %v397_v46  ;;  %v517_v48 = vpop.f32.mrb[5].mxu1 }
 0x2b6   :  { %v400_v49 = vpop.f32.mrb[6].mxu1 }
 0x2b7   :  { %v403_v51 = vmax.f32 %v398_v47, 0.0  ;;  %v518_v52 = vpop.f32.mrb[7].mxu1 }
 0x2b9   :  { %v411_v53 = vmul.f32 %v444_v50, %v403_v51 }
 0x2bb   :  { %412 = vadd.xlane.f32.xlu0 %v411_v53 }
 0x348   :  { %v413_v54 = vpop.xlane.xlu0 %412 }
 0x349   :  { %415 = vst.msk [vmem:[%s738_s10] sm:$0xff] %vm414_vm4, %v413_v54 }
 0x34a   :  { %420 = vsyncpa [#allocation3], 1 }
 0x34b   :  { %421 = vsyncpa [#allocation5], 1 }

</bundles_post_ra>
